<compile_context>
chip_gen: v6e
topology: v6e:2x2x1
jax: 0.10.0
libtpu: 0.0.40
codegen_flags: <defaults>
</compile_context>

<pallas_src>
import jax
import jax.numpy as jnp
from jax.experimental import pallas as pl
from jax.experimental.pallas import tpu as pltpu

K, C = 3, 7          # hard-coded in the PyTorch module (repeat(1,3,1) / repeat(1,1,7))
KC = K * C


def _kice_loss_kernel(t_ref, x_ref, x0_ref, o_ref):
    n = x_ref.shape[0]
    x = x_ref[...]                                    # (N, KC) f32, one lane-dense tile
    t_col = t_ref[...]                                # (N, 1)  int32

    # ---- e_t[n, k] = input[n, k, target[n]]  and  id[n] = argmax_k e_t[n, k] ----
    # Column j of the flattened layout holds (head j // C, class j % C), so head k's
    # gathered value sits in column target[n] + C*k.  Each e_k is one exact masked
    # lane reduction (VPU select + XLU reduce); the argmax is a running first-max.
    col_iota = jax.lax.broadcasted_iota(jnp.int32, (n, KC), 1)
    best = jnp.sum(jnp.where(col_iota == t_col, x, 0.0), axis=-1, keepdims=True)   # k = 0
    best_id = jnp.zeros((n, 1), jnp.int32)
    for k in range(1, K):                             # K-1 = 2 static steps
        e_k = jnp.sum(jnp.where(col_iota == t_col + C * k, x, 0.0),
                      axis=-1, keepdims=True)
        better = e_k > best                           # strict > keeps first max on ties
        best = jnp.where(better, e_k, best)
        best_id = jnp.where(better, k, best_id)

    # ---- logits[n, :] = input[0, id[n], :]  (only batch row 0: PyTorch quirk) ----
    x0 = x0_ref[...]                                  # (K, C) = input[0]
    logits = jnp.where(best_id == 0, x0[0:1, :],
                       jnp.where(best_id == 1, x0[1:2, :], x0[2:3, :]))             # (N, C)

    # ---- mean cross entropy ----
    c_iota = jax.lax.broadcasted_iota(jnp.int32, (n, C), 1)
    true_logit = jnp.sum(jnp.where(c_iota == t_col, logits, 0.0),
                         axis=-1, keepdims=True)                                    # (N, 1)
    row_max = jnp.max(logits, axis=-1, keepdims=True)
    lse = row_max + jnp.log(jnp.sum(jnp.exp(logits - row_max), axis=-1, keepdims=True))
    o_ref[0, 0] = jnp.sum(lse - true_logit) * (1.0 / n)


def kice_loss(x, target):
    """x: (N, 3, 7) float32 logits; target: (N,) int class indices in [0, 7)."""
    n, k, c = x.shape
    assert (k, c) == (K, C), "KICELoss hard-codes 3 heads and 7 classes"
    xf = x.reshape(n, KC)                             # lane-dense single-tile layout
    x0 = x[0]                                         # (3, 7) batch-0 slab for 2nd gather
    t = target.astype(jnp.int32).reshape(n, 1)        # (N, 1) column for VPU compares
    # TODO(synk): at (8,3,7) this op is a few dozen FLOPs; if it sits next to another
    # Pallas kernel (e.g. the projection producing `x`), fuse it there instead of
    # paying a standalone pallas_call launch + DMA.
    out = pl.pallas_call(
        _kice_loss_kernel,
        out_shape=jax.ShapeDtypeStruct((1, 1), jnp.float32),
        in_specs=[
            pl.BlockSpec((n, 1), lambda: (0, 0)),     # target column
            pl.BlockSpec((n, KC), lambda: (0, 0)),    # flattened logits (one VMEM tile)
            pl.BlockSpec((K, C), lambda: (0, 0)),     # input[0] slab
        ],
        out_specs=pl.BlockSpec(memory_space=pltpu.MemorySpace.SMEM),   # scalar loss
    )(t, xf, x0)
    return out[0, 0]


def ref_loss(x, target):
    """Pure-JAX reference mirroring the PyTorch forward exactly."""
    n = x.shape[0]
    e_t = x[jnp.arange(n), :, target]                 # (N, K): input[n, k, target[n]]
    idx = jnp.argmax(e_t, axis=1)                     # (N,)
    logits = x[0, idx, :]                             # (N, C): only batch 0 of input
    lse = jax.scipy.special.logsumexp(logits, axis=-1)
    tl = logits[jnp.arange(n), target]
    return jnp.mean(lse - tl)


if __name__ == "__main__":
    N = 8
    key = jax.random.PRNGKey(0)
    kx, kt = jax.random.split(key)
    x = jax.random.normal(kx, (N, K, C), dtype=jnp.float32)
    target = jax.random.randint(kt, (N,), 0, C, dtype=jnp.int32)

    loss = kice_loss(x, target)
    jax.block_until_ready(loss)

    ref = ref_loss(x, target)
    assert abs(float(loss) - float(ref)) < 1e-4, (float(loss), float(ref))
    print("KERNEL_OK")
</pallas_src>

<mosaic_0001>
module attributes {stable_mosaic.version = 11 : i64} {
  func.func @_kice_loss_kernel(%arg0: memref<8x1xi32, #tpu.memory_space<vmem>>, %arg1: memref<8x21xf32, #tpu.memory_space<vmem>>, %arg2: memref<3x7xf32, #tpu.memory_space<vmem>>, %arg3: memref<1x1xf32, #tpu.memory_space<smem>>) attributes {dimension_semantics = [], scalar_prefetch = 0 : i64, scratch_operands = 0 : i64, tpu.core_type = #tpu.core_type<tc>} {
    %c0 = arith.constant 0 : index
    %c0_0 = arith.constant 0 : index
    %0 = vector.load %arg1[%c0, %c0_0] : memref<8x21xf32, #tpu.memory_space<vmem>>, vector<8x21xf32>
    %c0_1 = arith.constant 0 : index
    %c0_2 = arith.constant 0 : index
    %1 = vector.load %arg0[%c0_1, %c0_2] : memref<8x1xi32, #tpu.memory_space<vmem>>, vector<8x1xi32>
    %2 = tpu.iota {dimensions = array<i32: 1>} : vector<8x21xi32>
    %3 = vector.broadcast %1 : vector<8x1xi32> to vector<8x21xi32>
    %4 = arith.cmpi eq, %2, %3 : vector<8x21xi32>
    %cst = arith.constant 0.000000e+00 : f32
    %5 = vector.broadcast %cst : f32 to vector<8x21xf32>
    %6 = arith.select %4, %0, %5 : vector<8x21xi1>, vector<8x21xf32>
    %cst_3 = arith.constant dense<0.000000e+00> : vector<8xf32>
    %7 = vector.multi_reduction <add>, %6, %cst_3 [1] : vector<8x21xf32> to vector<8xf32>
    %8 = vector.shape_cast %7 : vector<8xf32> to vector<8x1xf32>
    %c0_i32 = arith.constant 0 : i32
    %9 = vector.broadcast %c0_i32 : i32 to vector<8x1xi32>
    %c7_i32 = arith.constant 7 : i32
    %10 = vector.broadcast %c7_i32 : i32 to vector<8x1xi32>
    %11 = arith.addi %1, %10 : vector<8x1xi32>
    %12 = vector.broadcast %11 : vector<8x1xi32> to vector<8x21xi32>
    %13 = arith.cmpi eq, %2, %12 : vector<8x21xi32>
    %cst_4 = arith.constant 0.000000e+00 : f32
    %14 = vector.broadcast %cst_4 : f32 to vector<8x21xf32>
    %15 = arith.select %13, %0, %14 : vector<8x21xi1>, vector<8x21xf32>
    %cst_5 = arith.constant dense<0.000000e+00> : vector<8xf32>
    %16 = vector.multi_reduction <add>, %15, %cst_5 [1] : vector<8x21xf32> to vector<8xf32>
    %17 = vector.shape_cast %16 : vector<8xf32> to vector<8x1xf32>
    %18 = arith.cmpf ogt, %17, %8 : vector<8x1xf32>
    %19 = arith.select %18, %17, %8 : vector<8x1xi1>, vector<8x1xf32>
    %c1_i32 = arith.constant 1 : i32
    %20 = vector.broadcast %c1_i32 : i32 to vector<8x1xi32>
    %21 = arith.select %18, %20, %9 : vector<8x1xi1>, vector<8x1xi32>
    %c14_i32 = arith.constant 14 : i32
    %22 = vector.broadcast %c14_i32 : i32 to vector<8x1xi32>
    %23 = arith.addi %1, %22 : vector<8x1xi32>
    %24 = vector.broadcast %23 : vector<8x1xi32> to vector<8x21xi32>
    %25 = arith.cmpi eq, %2, %24 : vector<8x21xi32>
    %cst_6 = arith.constant 0.000000e+00 : f32
    %26 = vector.broadcast %cst_6 : f32 to vector<8x21xf32>
    %27 = arith.select %25, %0, %26 : vector<8x21xi1>, vector<8x21xf32>
    %cst_7 = arith.constant dense<0.000000e+00> : vector<8xf32>
    %28 = vector.multi_reduction <add>, %27, %cst_7 [1] : vector<8x21xf32> to vector<8xf32>
    %29 = vector.shape_cast %28 : vector<8xf32> to vector<8x1xf32>
    %30 = arith.cmpf ogt, %29, %19 : vector<8x1xf32>
    %c2_i32 = arith.constant 2 : i32
    %31 = vector.broadcast %c2_i32 : i32 to vector<8x1xi32>
    %32 = arith.select %30, %31, %21 : vector<8x1xi1>, vector<8x1xi32>
    %c0_8 = arith.constant 0 : index
    %c0_9 = arith.constant 0 : index
    %33 = vector.load %arg2[%c0_8, %c0_9] : memref<3x7xf32, #tpu.memory_space<vmem>>, vector<3x7xf32>
    %c0_i32_10 = arith.constant 0 : i32
    %34 = vector.broadcast %c0_i32_10 : i32 to vector<8x1xi32>
    %35 = arith.cmpi eq, %32, %34 : vector<8x1xi32>
    %36 = vector.extract_strided_slice %33 {offsets = [0, 0], sizes = [1, 7], strides = [1, 1]} : vector<3x7xf32> to vector<1x7xf32>
    %c1_i32_11 = arith.constant 1 : i32
    %37 = vector.broadcast %c1_i32_11 : i32 to vector<8x1xi32>
    %38 = arith.cmpi eq, %32, %37 : vector<8x1xi32>
    %39 = vector.extract_strided_slice %33 {offsets = [1, 0], sizes = [1, 7], strides = [1, 1]} : vector<3x7xf32> to vector<1x7xf32>
    %40 = vector.extract_strided_slice %33 {offsets = [2, 0], sizes = [1, 7], strides = [1, 1]} : vector<3x7xf32> to vector<1x7xf32>
    %41 = vector.shape_cast %38 : vector<8x1xi1> to vector<8x1xi1>
    %42 = vector.broadcast %41 : vector<8x1xi1> to vector<8x7xi1>
    %43 = vector.shape_cast %39 : vector<1x7xf32> to vector<1x7xf32>
    %44 = vector.broadcast %43 : vector<1x7xf32> to vector<8x7xf32>
    %45 = vector.shape_cast %40 : vector<1x7xf32> to vector<1x7xf32>
    %46 = vector.broadcast %45 : vector<1x7xf32> to vector<8x7xf32>
    %47 = arith.select %42, %44, %46 : vector<8x7xi1>, vector<8x7xf32>
    %48 = vector.shape_cast %35 : vector<8x1xi1> to vector<8x1xi1>
    %49 = vector.broadcast %48 : vector<8x1xi1> to vector<8x7xi1>
    %50 = vector.shape_cast %36 : vector<1x7xf32> to vector<1x7xf32>
    %51 = vector.broadcast %50 : vector<1x7xf32> to vector<8x7xf32>
    %52 = arith.select %49, %51, %47 : vector<8x7xi1>, vector<8x7xf32>
    %53 = tpu.iota {dimensions = array<i32: 1>} : vector<8x7xi32>
    %54 = vector.broadcast %1 : vector<8x1xi32> to vector<8x7xi32>
    %55 = arith.cmpi eq, %53, %54 : vector<8x7xi32>
    %cst_12 = arith.constant 0.000000e+00 : f32
    %56 = vector.broadcast %cst_12 : f32 to vector<8x7xf32>
    %57 = arith.select %55, %52, %56 : vector<8x7xi1>, vector<8x7xf32>
    %cst_13 = arith.constant dense<0.000000e+00> : vector<8xf32>
    %58 = vector.multi_reduction <add>, %57, %cst_13 [1] : vector<8x7xf32> to vector<8xf32>
    %59 = vector.shape_cast %58 : vector<8xf32> to vector<8x1xf32>
    %cst_14 = arith.constant dense<0xFF800000> : vector<8xf32>
    %60 = vector.multi_reduction <maximumf>, %52, %cst_14 [1] : vector<8x7xf32> to vector<8xf32>
    %61 = vector.shape_cast %60 : vector<8xf32> to vector<8x1xf32>
    %62 = vector.broadcast %61 : vector<8x1xf32> to vector<8x7xf32>
    %63 = arith.subf %52, %62 : vector<8x7xf32>
    %64 = math.exp %63 : vector<8x7xf32>
    %cst_15 = arith.constant dense<0.000000e+00> : vector<8xf32>
    %65 = vector.multi_reduction <add>, %64, %cst_15 [1] : vector<8x7xf32> to vector<8xf32>
    %66 = vector.shape_cast %65 : vector<8xf32> to vector<8x1xf32>
    %67 = math.log %66 : vector<8x1xf32>
    %68 = arith.addf %61, %67 : vector<8x1xf32>
    %69 = arith.subf %68, %59 : vector<8x1xf32>
    %70 = vector.shape_cast %69 : vector<8x1xf32> to vector<1x8x1xf32>
    %cst_16 = arith.constant dense<0.000000e+00> : vector<1xf32>
    %71 = vector.multi_reduction <add>, %70, %cst_16 [1, 2] : vector<1x8x1xf32> to vector<1xf32>
    %72 = vector.shape_cast %71 : vector<1xf32> to vector<1x1x1xf32>
    %73 = vector.extract %72[0, 0, 0] : f32 from vector<1x1x1xf32>
    %cst_17 = arith.constant 1.250000e-01 : f32
    %74 = arith.mulf %73, %cst_17 : f32
    %c0_18 = arith.constant 0 : index
    %c0_19 = arith.constant 0 : index
    %75 = memref.load %arg3[%c0_18, %c0_19] : memref<1x1xf32, #tpu.memory_space<smem>>
    memref.store %74, %arg3[%c0_18, %c0_19] : memref<1x1xf32, #tpu.memory_space<smem>>
    return
  }
}

</mosaic_0001>

<bundles_post_ra>
// kernel: tpu_custom_call.1
= control target key start
LH: loop header
LB: loop body
LE: loop exit
PB: predicated region body
PF: predicated region fallthrough
CT: control target
= control target key end

     0   :  { %s173_s0 = inlined_call_operand.vmem [shape: s32[8,1], index: 0, kind: input, shape index: {}]   ;;  %s174_s1 = inlined_call_operand.vmem [shape: f32[8,21], index: 1, kind: input, shape index: {}]   ;;  %s175_s2 = inlined_call_operand.vmem [shape: f32[3,7], index: 2, kind: input, shape index: {}]   ;;  %s176_s3 = inlined_call_operand.hbm [shape: f32[1,1], index: 3, kind: output, shape index: {}]  }
   0x1   :  { %v16_v0 = vld [vmem:[%s173_s0] sm:$0xff] }
   0x2   :  { %8 = vsyncpa [#allocation3], 0  ;;  %v137_v1 = vmov 0   ;;  %v40_v2 = vadd.s32 14, %v16_v0  ;;  %v28_v3 = vadd.s32 7, %v16_v0  ;;  %v17_v4 = vlaneseq  ;;  %v15_v6 = vld [vmem:[%s174_s1] sm:$0xff] }
   0x3   :  { %121 = vset.pattern.permute.xlu0 %v137_v1  ;;  %122 = vset.pattern.permute.xlu1 %v137_v1  ;;  %vm24_vm0 = vcmask 171008   ;;  %v51_v21 = vld [vmem:[%s175_s2] sm:$0x7]  ;;  %vm73_vm8 = vcmask 56320   ;;  %vm90_vm9 = vcmask 7168   ;;  %s138_s17 = smov [#allocation2]  }
   0x4   :  { %20 = vperm.xlu0 %121, %v16_v0   ;;  %42 = vperm.xlu1 %122, %v40_v2   ;;  %v18_v5 = vand.u32 127, %v17_v4  ;;  %v57_v16 = vshrl.u32 %v17_v4, 7 }
   0x6   :  { %v58_v19 = vsub.s32 1, %v57_v16  ;;  %v62_v20 = vsub.s32 2, %v57_v16  ;;  %v69_v22 = vsub.s32 0, %v57_v16 }
   0x8   :  { %30 = vperm.xlu0 %121, %v28_v3   ;;  %v59_v23 = vrot.slane %v51_v21, %v58_v19  ;;  %v63_v24 = vrot.slane %v51_v21, %v62_v20  ;;  %v70_v28 = vrot.slane %v51_v21, %v69_v22 }
  0x7f   :  { %v21_v7 = vpop.permute.xlu0 %20  ;;  %v43_v8 = vpop.permute.xlu1 %42 }
  0x80   :  { %vm22_vm1 = vcmp.eq.s32.totalorder %v18_v5, %v21_v7  ;;  %vm44_vm2 = vcmp.eq.s32.totalorder %v18_v5, %v43_v8 }
  0x81   :  { %v23_v9 = vsel %vm22_vm1, %v15_v6, 0.0  ;;  %v45_v13 = vsel %vm44_vm2, %v15_v6, 0.0 }
  0x82   :  { %v25_v10 = vsel %vm24_vm0, %v23_v9, 0.0  ;;  %v46_v15 = vsel %vm24_vm0, %v45_v13, 0.0 }
  0x83   :  { %v31_v11 = vpop.permute.xlu0 %30  ;;  %26 = vadd.xlane.f32.xlu1 %v25_v10 }
  0x84   :  { %vm32_vm3 = vcmp.eq.s32.totalorder %v18_v5, %v31_v11 }
  0x85   :  { %v33_v12 = vsel %vm32_vm3, %v15_v6, 0.0 }
  0x86   :  { %v34_v14 = vsel %vm24_vm0, %v33_v12, 0.0 }
  0x87   :  { %35 = vadd.xlane.f32.xlu0 %v34_v14 }
  0x8b   :  { %47 = vadd.xlane.f32.xlu0 %v46_v15 }
 0x10c   :  { %v27_v17 = vpop.xlane.xlu1 %26 }
 0x110   :  { %v36_v18 = vpop.xlane.xlu0 %35 }
 0x111   :  { %vm37_vm4 = vcmp.gt.f32.partialorder %v36_v18, %v27_v17 }
 0x112   :  { %v38_v26 = vsel %vm37_vm4, %v36_v18, %v27_v17  ;;  %v39_v27 = vsel %vm37_vm4, 1, %v137_v1 }
 0x114   :  { %v48_v25 = vpop.xlane.xlu0 %47 }
 0x115   :  { %vm49_vm5 = vcmp.gt.f32.partialorder %v48_v25, %v38_v26 }
 0x116   :  { %v50_v29 = vsel %vm49_vm5, 2, %v39_v27 }
 0x117   :  { %vm52_vm6 = vcmp.eq.s32.totalorder %v50_v29, 0  ;;  %vm53_vm7 = vcmp.eq.s32.totalorder %v50_v29, 1 }
 0x118   :  { %v64_v30 = vsel %vm53_vm7, %v59_v23, %v63_v24 }
 0x119   :  { %v71_v31 = vsel %vm52_vm6, %v70_v28, %v64_v30 }
 0x11a   :  { %v77_v32 = vsel %vm73_vm8, %v71_v31, -inf  ;;  %v72_v33 = vsel %vm22_vm1, %v71_v31, 0.0 }
 0x11b   :  { %78 = vmax.xlane.f32.xlu1 %v77_v32  ;;  %v74_v34 = vsel %vm73_vm8, %v72_v33, 0.0 }
 0x11f   :  { %75 = vadd.xlane.f32.xlu1 %v74_v34 }
 0x1a4   :  { %v79_v35 = vpop.xlane.xlu1 %78 }
 0x1a5   :  { %v80_v36 = vsub.f32 %v71_v31, %v79_v35 }
 0x1a7   :  { %v81_v37 = vmul.f32 1.442695, %v80_v36 }
 0x1a8   :  { %v76_v44 = vpop.xlane.xlu1 %75 }
 0x1a9   :  { %123 = vpow2.f32 %v81_v37 }
 0x1b6   :  { %v124_v38 = vpop.eup %123 }
 0x1b7   :  { %v83_v39 = vsel %vm73_vm8, %v124_v38, 0.0 }
 0x1b8   :  { %84 = vadd.xlane.f32.xlu0 %v83_v39 }
 0x241   :  { %v85_v40 = vpop.xlane.xlu0 %84 }
 0x242   :  { %125 = vlog2.f32 %v85_v40 }
 0x24f   :  { %v126_v41 = vpop.eup %125 }
 0x250   :  { %v87_v42 = vmul.f32 0.6931472, %v126_v41 }
 0x252   :  { %v88_v43 = vadd.f32 %v87_v42, %v79_v35 }
 0x254   :  { %v89_v45 = vsub.f32 %v88_v43, %v76_v44 }
 0x256   :  { %v91_v46 = vsel %vm90_vm9, %v89_v45, 0.0 }
 0x257   :  { %92 = vadd.xlane.f32.xlu0 %v91_v46 }
 0x2e0   :  { %v93_v47 = vpop.xlane.xlu0 %92 }
 0x2e1   :  { %v94_v48 = vrot.slane %v93_v47, 4 }
 0x2e3   :  { %v95_v49 = vadd.f32 %v94_v48, %v93_v47 }
 0x2e5   :  { %v96_v50 = vrot.slane %v95_v49, 2 }
 0x2e7   :  { %v97_v51 = vadd.f32 %v96_v50, %v95_v49 }
 0x2e9   :  { %v98_v52 = vrot.slane %v97_v51, 1 }
 0x2eb   :  { %v99_v53 = vadd.f32 %v98_v52, %v97_v51 }
 0x2ed   :  { %117 = vpush %v99_v53 }
 0x31e   :  { %s118_s2 = spop %117 }
 0x31f   :  { %s101_s16 = smul.f32 0.125, %s118_s2 }
 0x321   :  { %103 = sst [smem:[#allocation2]] %s101_s16 }
 0x322   :  { %111 = dma.smem_to_hbm %s138_s17, 16, %s176_s3, [#allocation3]  }
 0x323   :  { %135 = dma.done.wait [#allocation3], 16  }
 0x324   :  { %136 = vsyncadd [#allocation3], 4294967280 }
 0x325   :  { %115 = sfence }
 0x326   :  { %116 = vsyncpa [#allocation3], 1 }

</bundles_post_ra>
